<compile_context>
chip_gen: v7x
topology: tpu7x:2x2x1
jax: 0.10.0
libtpu: 0.0.40
codegen_flags: <defaults>
</compile_context>

<pallas_src>
import functools

import jax
import jax.numpy as jnp
from jax import lax
from jax.experimental import pallas as pl
from jax.experimental.pallas import tpu as pltpu


# ----------------------------------------------------------------------------- helpers


def _round_up(x: int, m: int) -> int:
    return ((x + m - 1) // m) * m


@functools.lru_cache(maxsize=None)
def _vmem_limit_bytes() -> int:
    """Generation-aware scoped-VMEM limit: ~96 MiB on 128-MiB parts (v5e/v6e),
    ~44 MiB on 64-MiB parts (v7x). Falls back to a safe 44 MiB."""
    try:
        cap = int(pltpu.get_tpu_info().vmem_capacity_bytes)
        if cap >= 96 * 1024 * 1024:
            return 96 * 1024 * 1024
        return min(44 * 1024 * 1024, max(cap - 16 * 1024 * 1024, 32 * 1024 * 1024))
    except Exception:
        return 44 * 1024 * 1024


def _pick_tile(dim: int, cap: int = 512, align: int = 128):
    """Pick a lane-dense tile (multiple of `align`, <= cap) and the padded extent.
    Prefers the largest tile whose padding overhead stays within ~12.5%."""
    dim_al = _round_up(dim, align)
    t = cap
    while t >= align:
        p = _round_up(dim, t)
        if p <= dim_al * 1.125 + 1e-9:
            return t, p
        t -= align
    return align, dim_al


def _pick_tile_m(m: int, cap: int = 512):
    """M tile: multiple of 16 (bf16 sublane packing); big, modest padding overhead."""
    if m <= cap:
        t = _round_up(m, 16)
        return t, t
    m_al = _round_up(m, 16)
    t = cap
    while t >= 64:
        p = _round_up(m, t)
        if p <= m_al * 1.125 + 1e-9:
            return t, p
        t -= 64
    return 64, _round_up(m, 64)


def _largest_aligned_divisor(total: int, cap: int, align: int = 128) -> int:
    """Largest multiple of `align` that divides `total` and is <= cap (>= align)."""
    best = align
    cand = align
    while cand <= min(total, cap):
        if total % cand == 0:
            best = cand
        cand += align
    return best


# ----------------------------------------------------------------------------- kernels


def combine_w_kernel(coeffs_ref, w_ref, wt_ref):
    """Curve-combine one (nb, tn_c, tk_c) tile of the (nb, out, in) stack into a
    (tk_c, tn_c) tile of the pre-transposed (in, out) compute-dtype weight.

    coeffs_ref: SMEM (num_bends,) f32   (scalar-prefetched)
    w_ref:      VMEM (nb, tn_c, tk_c) f32   -- original (out, in) layout tile
    wt_ref:     VMEM (tk_c, tn_c) compute dtype
    """
    nb = w_ref.shape[0]
    acc = w_ref[0] * coeffs_ref[0]
    for j in range(1, nb):  # nb is static -> unrolled
        acc = acc + w_ref[j] * coeffs_ref[j]
    # One in-kernel (XLU) transpose per tile; rides a free slot in this mem-bound pass.
    wt_ref[...] = jnp.swapaxes(acc, 0, 1).astype(wt_ref.dtype)


def gemm_bias_kernel(x_ref, w_ref, b_ref, o_ref):
    """Tiled y = x @ w_t + b_t. Accumulates directly into the resident f32 output block.

    x_ref: VMEM (tm, tk) compute dtype
    w_ref: VMEM (tk, tn) compute dtype (already combined + transposed)
    b_ref: VMEM (1, tn)  f32
    o_ref: VMEM (tm, tn) f32   (resident across the K grid axis)
    """
    k = pl.program_id(2)

    @pl.when(k == 0)
    def _init():
        o_ref[...] = jnp.zeros_like(o_ref)

    o_ref[...] += jnp.dot(x_ref[...], w_ref[...], preferred_element_type=jnp.float32)

    @pl.when(k == pl.num_programs(2) - 1)
    def _epilogue():
        o_ref[...] += b_ref[...]


def fused_curve_gemm_kernel(coeffs_ref, x_ref, w_ref, b_ref, o_ref):
    """Small-batch path: curve-combine the weight tile and matmul in one pass.

    coeffs_ref: SMEM (num_bends,) f32
    x_ref: VMEM (tm, tk) compute dtype
    w_ref: VMEM (nb, tn, tk) f32   -- original (out, in) layout tile
    b_ref: VMEM (1, tn)  f32
    o_ref: VMEM (tm, tn) f32
    """
    k = pl.program_id(1)
    nb = w_ref.shape[0]

    @pl.when(k == 0)
    def _init():
        o_ref[...] = jnp.zeros_like(o_ref)

    w = w_ref[0] * coeffs_ref[0]
    for j in range(1, nb):
        w = w + w_ref[j] * coeffs_ref[j]
    w = w.astype(x_ref.dtype)  # (tn, tk)
    # Contract over the shared K (last) dim of both operands -> (tm, tn); no explicit
    # transpose of the combined tile is materialized.
    o_ref[...] += lax.dot_general(
        x_ref[...], w, (((1,), (1,)), ((), ())), preferred_element_type=jnp.float32)

    @pl.when(k == pl.num_programs(1) - 1)
    def _epilogue():
        o_ref[...] += b_ref[...]


# ----------------------------------------------------------------------------- wrappers


def _combine_weights(coeffs, w_stack_p, tn_c, tk_c, out_dtype):
    """coeffs (nb,) f32; w_stack_p (nb, N_pad, K_pad) f32 -> (K_pad, N_pad) out_dtype."""
    nb, n_pad, k_pad = w_stack_p.shape
    return pl.pallas_call(
        combine_w_kernel,
        out_shape=jax.ShapeDtypeStruct((k_pad, n_pad), out_dtype),
        grid_spec=pltpu.PrefetchScalarGridSpec(
            num_scalar_prefetch=1,  # coeffs -> SMEM
            grid=(k_pad // tk_c, n_pad // tn_c),
            in_specs=[pl.BlockSpec((nb, tn_c, tk_c), lambda i, j, c: (0, j, i))],
            out_specs=pl.BlockSpec((tk_c, tn_c), lambda i, j, c: (i, j)),
        ),
        compiler_params=pltpu.CompilerParams(
            dimension_semantics=("parallel", "parallel"),
            vmem_limit_bytes=_vmem_limit_bytes(),
        ),
    )(coeffs, w_stack_p)


def _gemm_bias(x_p, w_t, b_t, tm, tn, tk):
    """x (M_pad, K_pad); w (K_pad, N_pad); b (1, N_pad) f32 -> (M_pad, N_pad) f32."""
    m_pad, k_pad = x_p.shape
    _, n_pad = w_t.shape
    itemsize = jnp.dtype(x_p.dtype).itemsize
    cost = pl.CostEstimate(
        flops=2 * m_pad * n_pad * k_pad,
        transcendentals=0,
        bytes_accessed=(m_pad * k_pad * itemsize * (n_pad // tn)
                        + k_pad * n_pad * itemsize * (m_pad // tm)
                        + m_pad * n_pad * 4 + n_pad * 4),
    )
    return pl.pallas_call(
        gemm_bias_kernel,
        out_shape=jax.ShapeDtypeStruct((m_pad, n_pad), jnp.float32),
        grid_spec=pltpu.PrefetchScalarGridSpec(
            num_scalar_prefetch=0,
            grid=(m_pad // tm, n_pad // tn, k_pad // tk),
            in_specs=[
                pl.BlockSpec((tm, tk), lambda i, j, k: (i, k)),   # x
                pl.BlockSpec((tk, tn), lambda i, j, k: (k, j)),   # combined w (in, out)
                pl.BlockSpec((1, tn), lambda i, j, k: (0, j)),    # bias_t
            ],
            out_specs=pl.BlockSpec((tm, tn), lambda i, j, k: (i, j)),
        ),
        compiler_params=pltpu.CompilerParams(
            dimension_semantics=("parallel", "parallel", "arbitrary"),
            vmem_limit_bytes=_vmem_limit_bytes(),
        ),
        cost_estimate=cost,
    )(x_p, w_t, b_t)


def _fused_gemm(coeffs, x_p, w_stack_p, b_t, tm, tn, tk):
    """Single-M-tile path: combine + GEMM + bias in one kernel."""
    nb, n_pad, k_pad = w_stack_p.shape
    m_pad = x_p.shape[0]
    itemsize = jnp.dtype(x_p.dtype).itemsize
    cost = pl.CostEstimate(
        flops=2 * m_pad * n_pad * k_pad + 2 * nb * n_pad * k_pad,
        transcendentals=0,
        bytes_accessed=(nb * n_pad * k_pad * 4
                        + m_pad * k_pad * itemsize * (n_pad // tn)
                        + m_pad * n_pad * 4 + n_pad * 4),
    )
    return pl.pallas_call(
        fused_curve_gemm_kernel,
        out_shape=jax.ShapeDtypeStruct((m_pad, n_pad), jnp.float32),
        grid_spec=pltpu.PrefetchScalarGridSpec(
            num_scalar_prefetch=1,  # coeffs -> SMEM
            grid=(n_pad // tn, k_pad // tk),
            in_specs=[
                pl.BlockSpec((tm, tk), lambda j, k, c: (0, k)),        # x
                pl.BlockSpec((nb, tn, tk), lambda j, k, c: (0, j, k)),  # weight stack
                pl.BlockSpec((1, tn), lambda j, k, c: (0, j)),          # bias_t
            ],
            out_specs=pl.BlockSpec((tm, tn), lambda j, k, c: (0, j)),
        ),
        compiler_params=pltpu.CompilerParams(
            dimension_semantics=("parallel", "arbitrary"),
            vmem_limit_bytes=_vmem_limit_bytes(),
        ),
        cost_estimate=cost,
    )(coeffs, x_p, w_stack_p, b_t)


@functools.partial(jax.jit, static_argnames=("compute_dtype",))
def curve_linear(coeffs, x, w_stack, b_stack, *, compute_dtype=jnp.bfloat16):
    """Curved nn.Linear forward.

    coeffs:  (num_bends,) f32 curve coefficients at t (Coeffs_t.value)
    x:       (B, in_features)
    w_stack: (num_bends, out_features, in_features)   [weight_0 .. weight_{nb-1}]
    b_stack: (num_bends, out_features) or None        [bias_0 .. bias_{nb-1}]
    returns: (B, out_features) f32
    """
    m, k_dim = x.shape
    nb, n_dim, k_dim2 = w_stack.shape
    assert k_dim2 == k_dim

    coeffs = coeffs.astype(jnp.float32)

    # Tile selection (large, lane-dense, padding-aware).
    tn, n_pad = _pick_tile(n_dim)
    tk, k_pad = _pick_tile(k_dim)
    tm, m_pad = _pick_tile_m(m)
    m_blocks = m_pad // tm

    # v7x has 2 TensorCores: make sure there are >= 2 blocks along a parallel axis.
    if m_blocks * (n_pad // tn) < 2:
        tn = _largest_aligned_divisor(n_pad, cap=max(128, n_pad // 2))

    # Activations: cast to the compute dtype BEFORE padding (no f32 padded intermediate).
    x_c = x.astype(compute_dtype)
    if (m_pad, k_pad) != (m, k_dim):
        x_c = jnp.pad(x_c, ((0, m_pad - m), (0, k_pad - k_dim)))

    # Bias curve combine is tiny -> plain f32 einsum in the wrapper.
    if b_stack is None:
        b_t = jnp.zeros((1, n_pad), jnp.float32)
    else:
        b_t = jnp.einsum("j,jn->n", coeffs, b_stack.astype(jnp.float32))
        b_t = jnp.pad(b_t, (0, n_pad - n_dim)).reshape(1, n_pad)

    # Weight stack stays in its original (nb, out, in) layout (no wrapper transpose);
    # zero-pad only when the tile grid requires it.
    w_stack_f = w_stack.astype(jnp.float32)
    if (n_pad, k_pad) != (n_dim, k_dim):
        w_stack_f = jnp.pad(w_stack_f, ((0, 0), (0, n_pad - n_dim), (0, k_pad - k_dim)))

    if m_blocks == 1:
        # Small-batch / decode path: fuse the curve combine into the GEMM (no
        # intermediate combined-weight array, single kernel launch).
        y = _fused_gemm(coeffs, x_c, w_stack_f, b_t, tm, tn, tk)
    else:
        # Combine the curve weights exactly once (in-kernel transpose to a lane-dense
        # (K, N) compute-dtype slab), then run the tiled GEMM.
        tn_c = _largest_aligned_divisor(n_pad, cap=512)
        tk_c = _largest_aligned_divisor(k_pad, cap=512)
        w_t = _combine_weights(coeffs, w_stack_f, tn_c, tk_c, compute_dtype)
        y = _gemm_bias(x_c, w_t, b_t, tm, tn, tk)

    return y[:m, :n_dim]


# ----------------------------------------------------------------------------- demo / check

if __name__ == "__main__":
    key = jax.random.PRNGKey(0)

    def make_case(case_key, batch, in_features, out_features, num_bends, t):
        kx, kw, kb = jax.random.split(case_key, 3)
        # Init mirroring Linear.reset_parameters(): U(-stdv, stdv), stdv = 1/sqrt(in).
        stdv = 1.0 / (in_features ** 0.5)
        w_stack = jax.random.uniform(
            kw, (num_bends, out_features, in_features), jnp.float32,
            minval=-stdv, maxval=stdv)
        b_stack = jax.random.uniform(
            kb, (num_bends, out_features), jnp.float32, minval=-stdv, maxval=stdv)
        x = jax.random.normal(kx, (batch, in_features), jnp.float32)
        # Coeffs_t.value: Bezier coefficients at t for a 3-bend curve.
        coeffs = jnp.array([(1 - t) ** 2, 2 * t * (1 - t), t ** 2], jnp.float32)
        return coeffs, x, w_stack, b_stack

    def reference(coeffs, x, w_stack, b_stack):
        # Same numerics as the kernel: f32 curve combine, bf16 MXU, f32 accumulation.
        w_t = jnp.einsum("j,joi->oi", coeffs, w_stack)
        b_t = jnp.einsum("j,jo->o", coeffs, b_stack)
        return jnp.dot(x.astype(jnp.bfloat16), w_t.astype(jnp.bfloat16).T,
                       preferred_element_type=jnp.float32) + b_t

    # Case 1: small batch -> fused combine+GEMM path (single M tile).
    c1 = make_case(jax.random.fold_in(key, 1), 8, 32, 32, 3, 0.3)
    y1 = curve_linear(*c1)
    jax.block_until_ready(y1)
    assert y1.shape == (8, 32)
    assert jnp.allclose(y1, reference(*c1), atol=2e-3, rtol=2e-2), "fused path mismatch"

    # Case 2: larger batch with ragged dims -> separate combine pass + tiled GEMM path.
    c2 = make_case(jax.random.fold_in(key, 2), 640, 160, 192, 3, 0.7)
    y2 = curve_linear(*c2)
    jax.block_until_ready(y2)
    assert y2.shape == (640, 192)
    assert jnp.allclose(y2, reference(*c2), atol=2e-3, rtol=2e-2), "tiled path mismatch"

    print("KERNEL_OK")
</pallas_src>

<mosaic_0001>
module attributes {stable_mosaic.version = 11 : i64} {
  func.func @fused_curve_gemm_kernel(%arg0: i32, %arg1: i32, %arg2: memref<3xf32, #tpu.memory_space<smem>>, %arg3: memref<16x128xbf16, #tpu.memory_space<vmem>>, %arg4: memref<3x128x128xf32, #tpu.memory_space<vmem>>, %arg5: memref<1x128xf32, #tpu.memory_space<vmem>>, %arg6: memref<16x128xf32, #tpu.memory_space<vmem>>) attributes {dimension_semantics = [#tpu.dimension_semantics<parallel>, #tpu.dimension_semantics<arbitrary>], iteration_bounds = array<i64: 1, 1>, scalar_prefetch = 1 : i64, scratch_operands = 0 : i64, tpu.core_type = #tpu.core_type<tc>, window_params = [{transform_indices = @transform_0, window_bounds = array<i64: 16, 128>}, {transform_indices = @transform_1, window_bounds = array<i64: 3, 128, 128>}, {transform_indices = @transform_2, window_bounds = array<i64: 1, 128>}, {transform_indices = @transform_3, window_bounds = array<i64: 16, 128>}]} {
    %c0_i32 = arith.constant 0 : i32
    %0 = arith.cmpi eq, %arg1, %c0_i32 : i32
    %1 = arith.extui %0 : i1 to i32
    %c0_i32_0 = arith.constant 0 : i32
    %2 = arith.cmpi ne, %1, %c0_i32_0 : i32
    scf.if %2 {
      %cst_18 = arith.constant 0.000000e+00 : f32
      %29 = vector.broadcast %cst_18 : f32 to vector<16x128xf32>
      %c0_19 = arith.constant 0 : index
      %c0_20 = arith.constant 0 : index
      %30 = vector.load %arg6[%c0_19, %c0_20] : memref<16x128xf32, #tpu.memory_space<vmem>>, vector<16x128xf32>
      tpu.vector_store %arg6[%c0_19, %c0_20], %29 {strides = array<i32>} : memref<16x128xf32, #tpu.memory_space<vmem>>, vector<16x128xf32>,
    } else {
    }
    %c0 = arith.constant 0 : index
    %c0_1 = arith.constant 0 : index
    %c0_2 = arith.constant 0 : index
    %3 = vector.load %arg4[%c0, %c0_1, %c0_2] : memref<3x128x128xf32, #tpu.memory_space<vmem>>, vector<1x128x128xf32>
    %4 = vector.shape_cast %3 : vector<1x128x128xf32> to vector<128x128xf32>
    %c0_3 = arith.constant 0 : index
    %5 = memref.load %arg2[%c0_3] : memref<3xf32, #tpu.memory_space<smem>>
    %6 = vector.broadcast %5 : f32 to vector<128x128xf32>
    %7 = arith.mulf %4, %6 : vector<128x128xf32>
    %c1 = arith.constant 1 : index
    %c0_4 = arith.constant 0 : index
    %c0_5 = arith.constant 0 : index
    %8 = vector.load %arg4[%c1, %c0_4, %c0_5] : memref<3x128x128xf32, #tpu.memory_space<vmem>>, vector<1x128x128xf32>
    %9 = vector.shape_cast %8 : vector<1x128x128xf32> to vector<128x128xf32>
    %c1_6 = arith.constant 1 : index
    %10 = memref.load %arg2[%c1_6] : memref<3xf32, #tpu.memory_space<smem>>
    %11 = vector.broadcast %10 : f32 to vector<128x128xf32>
    %12 = arith.mulf %9, %11 : vector<128x128xf32>
    %13 = arith.addf %7, %12 : vector<128x128xf32>
    %c2 = arith.constant 2 : index
    %c0_7 = arith.constant 0 : index
    %c0_8 = arith.constant 0 : index
    %14 = vector.load %arg4[%c2, %c0_7, %c0_8] : memref<3x128x128xf32, #tpu.memory_space<vmem>>, vector<1x128x128xf32>
    %15 = vector.shape_cast %14 : vector<1x128x128xf32> to vector<128x128xf32>
    %c2_9 = arith.constant 2 : index
    %16 = memref.load %arg2[%c2_9] : memref<3xf32, #tpu.memory_space<smem>>
    %17 = vector.broadcast %16 : f32 to vector<128x128xf32>
    %18 = arith.mulf %15, %17 : vector<128x128xf32>
    %19 = arith.addf %13, %18 : vector<128x128xf32>
    %20 = arith.truncf %19 : vector<128x128xf32> to vector<128x128xbf16>
    %c0_10 = arith.constant 0 : index
    %c0_11 = arith.constant 0 : index
    %21 = vector.load %arg6[%c0_10, %c0_11] : memref<16x128xf32, #tpu.memory_space<vmem>>, vector<16x128xf32>
    %c0_12 = arith.constant 0 : index
    %c0_13 = arith.constant 0 : index
    %22 = vector.load %arg3[%c0_12, %c0_13] : memref<16x128xbf16, #tpu.memory_space<vmem>>, vector<16x128xbf16>
    %cst = arith.constant dense<0.000000e+00> : vector<16x128xf32>
    %23 = tpu.matmul %22, %20, %cst {dimension_numbers = #tpu.dot_dimension_numbers<[1], [1], [0], [0], [0, 0, 1, 0], [], []>} : vector<16x128xbf16>, vector<128x128xbf16>, vector<16x128xf32> -> vector<16x128xf32>
    %24 = arith.addf %21, %23 : vector<16x128xf32>
    %c0_14 = arith.constant 0 : index
    %c0_15 = arith.constant 0 : index
    %25 = vector.load %arg6[%c0_14, %c0_15] : memref<16x128xf32, #tpu.memory_space<vmem>>, vector<16x128xf32>
    tpu.vector_store %arg6[%c0_14, %c0_15], %24 {strides = array<i32>} : memref<16x128xf32, #tpu.memory_space<vmem>>, vector<16x128xf32>,
    %c0_i32_16 = arith.constant 0 : i32
    %26 = arith.cmpi eq, %arg1, %c0_i32_16 : i32
    %27 = arith.extui %26 : i1 to i32
    %c0_i32_17 = arith.constant 0 : i32
    %28 = arith.cmpi ne, %27, %c0_i32_17 : i32
    scf.if %28 {
      %c0_18 = arith.constant 0 : index
      %c0_19 = arith.constant 0 : index
      %29 = vector.load %arg6[%c0_18, %c0_19] : memref<16x128xf32, #tpu.memory_space<vmem>>, vector<16x128xf32>
      %c0_20 = arith.constant 0 : index
      %c0_21 = arith.constant 0 : index
      %30 = vector.load %arg5[%c0_20, %c0_21] : memref<1x128xf32, #tpu.memory_space<vmem>>, vector<1x128xf32>
      %31 = vector.broadcast %30 : vector<1x128xf32> to vector<16x128xf32>
      %32 = arith.addf %29, %31 : vector<16x128xf32>
      %c0_22 = arith.constant 0 : index
      %c0_23 = arith.constant 0 : index
      %33 = vector.load %arg6[%c0_22, %c0_23] : memref<16x128xf32, #tpu.memory_space<vmem>>, vector<16x128xf32>
      tpu.vector_store %arg6[%c0_22, %c0_23], %32 {strides = array<i32>} : memref<16x128xf32, #tpu.memory_space<vmem>>, vector<16x128xf32>,
    } else {
    }
    return
  }
  func.func @transform_0(%arg0: i32, %arg1: i32, %arg2: memref<3xf32, #tpu.memory_space<smem>>) -> (i32, i32) {
    %c0_i32 = arith.constant 0 : i32
    %c0_i32_0 = arith.constant 0 : i32
    return %c0_i32, %arg1 : i32, i32
  }
  func.func @transform_1(%arg0: i32, %arg1: i32, %arg2: memref<3xf32, #tpu.memory_space<smem>>) -> (i32, i32, i32) {
    %c0_i32 = arith.constant 0 : i32
    %c0_i32_0 = arith.constant 0 : i32
    return %c0_i32, %arg0, %arg1 : i32, i32, i32
  }
  func.func @transform_2(%arg0: i32, %arg1: i32, %arg2: memref<3xf32, #tpu.memory_space<smem>>) -> (i32, i32) {
    %c0_i32 = arith.constant 0 : i32
    %c0_i32_0 = arith.constant 0 : i32
    return %c0_i32, %arg0 : i32, i32
  }
  func.func @transform_3(%arg0: i32, %arg1: i32, %arg2: memref<3xf32, #tpu.memory_space<smem>>) -> (i32, i32) {
    %c0_i32 = arith.constant 0 : i32
    %c0_i32_0 = arith.constant 0 : i32
    return %c0_i32, %arg0 : i32, i32
  }
}

</mosaic_0001>

<bundles_post_ra>
// kernel: curve_linear.1
= control target key start
LH: loop header
LB: loop body
LE: loop exit
PB: predicated region body
PF: predicated region fallthrough
CT: control target
= control target key end

     0   :  { %s580_s0 = inlined_call_operand.vmem [shape: f32[3], index: 0, kind: input, shape index: {}]   ;;  %s581_s1 = inlined_call_operand.vmem [shape: bf16[16,128], index: 1, kind: input, shape index: {}]   ;;  %s582_s2 = inlined_call_operand.vmem [shape: f32[3,128,128], index: 2, kind: input, shape index: {}]   ;;  %s583_s3 = inlined_call_operand.vmem [shape: f32[1,128], index: 3, kind: input, shape index: {}]   ;;  %s584_s4 = inlined_call_operand.vmem [shape: f32[16,128], index: 4, kind: output, shape index: {}]  }
   0x1   :  { %s9_s17 = sshll.u32 %s580_s0, 4  ;;  %s10_s17 = int_to_ptr.vmem [resolvable:$true] %s9_s17 }
   0x2   :  { %s316_s18 = scalar_lea.vmem %s10_s17, 16  ;;  %p321_p1 = scmp.lt.s32.totalorder %s10_s17, %s10_s17 }
   0x3   :  { %p317_p0 = scmp.ne.s32.totalorder %s10_s17, %s316_s18  ;;  %p322_p2 = scmp.lt.s32.totalorder %s316_s18, %s316_s18 }
   0x5   :  { %p323_p3 = por %p322_p2, %p321_p1 }
   0x7   :  { %p324_p4 = pnand %p323_p3, %p317_p0 }
   0x9   :  { %327 = shalt.err (!%p324_p4)  }
   0xa   :  { %s330_s19 = smov [#allocation3]  }
   0xb   :  { %12 = dma.vmem_to_smem %s10_s17, 16, %s330_s19, [#allocation2] }
   0xc   :  { %328 = dma.done.wait [#allocation2], 16 }
   0xd   :  { %329 = vsyncadd [#allocation2], 4294967280 }
   0xe   :  { %14 = sfence }
   0xf   :  { %s44_s20 = sld [smem:[#allocation3]]  ;;  %v331_v0 = vmov 0.0   ;;  %s263_s21 = sld [smem:[#allocation3 + $0x1]]  ;;  %vm332_vm0 = vmmov 0   ;;  %v28_v1 = vld [vmem:[%s582_s2] sm:$0xff]  ;;  %v29_v2 = vld [vmem:[%s582_s2 + $0x8] sm:$0xff] }
  0x10   :  { %292 = vmatprep.subr.bf16.mxu0 %v331_v0  ;;  %s280_s22 = sld [smem:[#allocation3 + $0x2]]  ;;  %308 = vmatprep.mubr.msk.bf16.mxu0 %vm332_vm0, %v331_v0  ;;  %v247_v3 = vld [vmem:[%s582_s2 + $0x80] sm:$0xff]  ;;  %v30_v4 = vld [vmem:[%s582_s2 + $0x10] sm:$0xff]  ;;  %v248_v5 = vld [vmem:[%s582_s2 + $0x88] sm:$0xff] }
  0x11   :  { %v264_v6 = vld [vmem:[%s582_s2 + $0x100] sm:$0xff]  ;;  %v31_v7 = vld [vmem:[%s582_s2 + $0x18] sm:$0xff]  ;;  %v265_v9 = vld [vmem:[%s582_s2 + $0x108] sm:$0xff] }
  0x12   :  { %v249_v10 = vld [vmem:[%s582_s2 + $0x90] sm:$0xff]  ;;  %v250_v11 = vld [vmem:[%s582_s2 + $0x98] sm:$0xff]  ;;  %v32_v34 = vld [vmem:[%s582_s2 + $0x20] sm:$0xff] }
  0x13   :  { %v266_v20 = vld [vmem:[%s582_s2 + $0x110] sm:$0xff]  ;;  %v267_v21 = vld [vmem:[%s582_s2 + $0x118] sm:$0xff]  ;;  %v33_v35 = vld [vmem:[%s582_s2 + $0x28] sm:$0xff] }
  0x14   :  { %v251_v36 = vld [vmem:[%s582_s2 + $0xa0] sm:$0xff]  ;;  %v252_v37 = vld [vmem:[%s582_s2 + $0xa8] sm:$0xff]  ;;  %v34_v52 = vld [vmem:[%s582_s2 + $0x30] sm:$0xff] }
  0x15   :  { %v384_v8 = vstv %s44_s20  ;;  %v397_v14 = vstv %s263_s21  ;;  %v268_v45 = vld [vmem:[%s582_s2 + $0x120] sm:$0xff]  ;;  %v269_v46 = vld [vmem:[%s582_s2 + $0x128] sm:$0xff] }
  0x16   :  { %v46_v12 = vmul.f32 %v384_v8, %v28_v1  ;;  %v47_v13 = vmul.f32 %v384_v8, %v29_v2  ;;  %v48_v15 = vmul.f32 %v384_v8, %v30_v4  ;;  %v81_v16 = vmul.f32 %v247_v3, %v397_v14  ;;  %v35_v53 = vld [vmem:[%s582_s2 + $0x38] sm:$0xff]  ;;  %v253_v54 = vld [vmem:[%s582_s2 + $0xb0] sm:$0xff] }
  0x17   :  { %v82_v17 = vmul.f32 %v248_v5, %v397_v14  ;;  %v402_v18 = vstv %s280_s22  ;;  %v49_v19 = vmul.f32 %v384_v8, %v31_v7  ;;  %v83_v24 = vmul.f32 %v249_v10, %v397_v14  ;;  %v254_v55 = vld [vmem:[%s582_s2 + $0xb8] sm:$0xff]  ;;  %v270_v62 = vld [vmem:[%s582_s2 + $0x130] sm:$0xff]  ;;  %v37_v7 = vld [vmem:[%s582_s2 + $0x48] sm:$0xff] }
  0x18   :  { %v132_v22 = vmul.f32 %v264_v6, %v402_v18  ;;  %v133_v23 = vmul.f32 %v265_v9, %v402_v18  ;;  %v84_v25 = vmul.f32 %v250_v11, %v397_v14  ;;  %v97_v26 = vadd.f32 %v81_v16, %v46_v12  ;;  %v271_v63 = vld [vmem:[%s582_s2 + $0x138] sm:$0xff]  ;;  %v36_v6 = vld [vmem:[%s582_s2 + $0x40] sm:$0xff]  ;;  %v256_v10 = vld [vmem:[%s582_s2 + $0xc8] sm:$0xff] }
  0x19   :  { %v98_v27 = vadd.f32 %v82_v17, %v47_v13  ;;  %v134_v28 = vmul.f32 %v266_v20, %v402_v18  ;;  %v135_v29 = vmul.f32 %v267_v21, %v402_v18  ;;  %v99_v32 = vadd.f32 %v83_v24, %v48_v15  ;;  %v255_v9 = vld [vmem:[%s582_s2 + $0xc0] sm:$0xff]  ;;  %v273_v20 = vld [vmem:[%s582_s2 + $0x148] sm:$0xff] }
  0x1a   :  { %v148_v30 = vadd.f32 %v132_v22, %v97_v26  ;;  %v100_v33 = vadd.f32 %v84_v25, %v49_v19  ;;  %v50_v39 = vmul.f32 %v384_v8, %v32_v34  ;;  %v51_v40 = vmul.f32 %v384_v8, %v33_v35  ;;  %v272_v19 = vld [vmem:[%s582_s2 + $0x140] sm:$0xff]  ;;  %v38_v26 = vld [vmem:[%s582_s2 + $0x50] sm:$0xff] }
  0x1b   :  { %v149_v31 = vadd.f32 %v133_v23, %v98_v27  ;;  %v150_v41 = vadd.f32 %v134_v28, %v99_v32  ;;  %v85_v43 = vmul.f32 %v251_v36, %v397_v14  ;;  %v86_v44 = vmul.f32 %v252_v37, %v397_v14  ;;  %v39_v27 = vld [vmem:[%s582_s2 + $0x58] sm:$0xff]  ;;  %v257_v28 = vld [vmem:[%s582_s2 + $0xd0] sm:$0xff] }
  0x1c   :  { %v151_v42 = vadd.f32 %v135_v29, %v100_v33  ;;  %v136_v47 = vmul.f32 %v268_v45, %v402_v18  ;;  %v137_v51 = vmul.f32 %v269_v46, %v402_v18  ;;  %v52_v56 = vmul.f32 %v384_v8, %v34_v52  ;;  %v258_v29 = vld [vmem:[%s582_s2 + $0xd8] sm:$0xff]  ;;  %v274_v36 = vld [vmem:[%s582_s2 + $0x150] sm:$0xff]  ;;  %v259_v45 = vld [vmem:[%s582_s2 + $0xe0] sm:$0xff] }
  0x1d   :  { %v164_v38 = vpack.c.bf16 %v149_v31, %v148_v30  ;;  %v101_v49 = vadd.f32 %v85_v43, %v50_v39  ;;  %v102_v50 = vadd.f32 %v86_v44, %v51_v40  ;;  %v53_v57 = vmul.f32 %v384_v8, %v35_v53  ;;  %v275_v37 = vld [vmem:[%s582_s2 + $0x158] sm:$0xff]  ;;  %v40_v43 = vld [vmem:[%s582_s2 + $0x60] sm:$0xff]  ;;  %v41_v44 = vld [vmem:[%s582_s2 + $0x68] sm:$0xff] }
  0x1e   :  { %v165_v48 = vpack.c.bf16 %v151_v42, %v150_v41  ;;  %v87_v60 = vmul.f32 %v253_v54, %v397_v14  ;;  %v88_v61 = vmul.f32 %v254_v55, %v397_v14  ;;  %v138_v1 = vmul.f32 %v270_v62, %v402_v18  ;;  %v260_v46 = vld [vmem:[%s582_s2 + $0xe8] sm:$0xff]  ;;  %v276_v53 = vld [vmem:[%s582_s2 + $0x160] sm:$0xff]  ;;  %v261_v62 = vld [vmem:[%s582_s2 + $0xf0] sm:$0xff] }
  0x1f   :  { %293 = vmatpush3.bf16.xpose.msra.mxu0 %v164_v38  ;;  %v152_v58 = vadd.f32 %v136_v47, %v101_v49  ;;  %v153_v59 = vadd.f32 %v137_v51, %v102_v50  ;;  %v139_v5 = vmul.f32 %v271_v63, %v402_v18  ;;  %v54_v11 = vmul.f32 %v384_v8, %v36_v6  ;;  %v277_v54 = vld [vmem:[%s582_s2 + $0x168] sm:$0xff]  ;;  %v262_v63 = vld [vmem:[%s582_s2 + $0xf8] sm:$0xff] }
  0x20   :  { %294 = vmatprep.subr.bf16.mxu0 %v331_v0  ;;  %v103_v3 = vadd.f32 %v87_v60, %v52_v56  ;;  %v104_v4 = vadd.f32 %v88_v61, %v53_v57  ;;  %v55_v12 = vmul.f32 %v384_v8, %v37_v7  ;;  %v89_v16 = vmul.f32 %v255_v9, %v397_v14  ;;  %v42_v60 = vld [vmem:[%s582_s2 + $0x70] sm:$0xff]  ;;  %v43_v61 = vld [vmem:[%s582_s2 + $0x78] sm:$0xff] }
  0x21   :  { %v166_v2 = vpack.c.bf16 %v153_v59, %v152_v58  ;;  %v90_v17 = vmul.f32 %v256_v10, %v397_v14  ;;  %v140_v21 = vmul.f32 %v272_v19, %v402_v18  ;;  %v141_v25 = vmul.f32 %v273_v20, %v402_v18  ;;  %v278_v7 = vld [vmem:[%s582_s2 + $0x170] sm:$0xff]  ;;  %v279_v9 = vld [vmem:[%s582_s2 + $0x178] sm:$0xff]  ;;  %v282_v20 = vld [vmem:[%s583_s3] ss:$0 sm:$0xff] }
  0x22   :  { %v154_v13 = vadd.f32 %v138_v1, %v103_v3  ;;  %v155_v15 = vadd.f32 %v139_v5, %v104_v4  ;;  %v105_v23 = vadd.f32 %v89_v16, %v54_v11  ;;  %v56_v30 = vmul.f32 %v384_v8, %v38_v26 }
  0x23   :  { %v106_v24 = vadd.f32 %v90_v17, %v55_v12  ;;  %v57_v31 = vmul.f32 %v384_v8, %v39_v27  ;;  %v91_v34 = vmul.f32 %v257_v28, %v397_v14  ;;  %v92_v35 = vmul.f32 %v258_v29, %v397_v14  ;;  %v315_v17 = vld [vmem:[%s581_s1] sm:$0xff]  }
  0x24   :  { %v167_v22 = vpack.c.bf16 %v155_v15, %v154_v13  ;;  %v156_v32 = vadd.f32 %v140_v21, %v105_v23  ;;  %v142_v38 = vmul.f32 %v274_v36, %v402_v18  ;;  %v143_v42 = vmul.f32 %v275_v37, %v402_v18 }
  0x25   :  { %v157_v33 = vadd.f32 %v141_v25, %v106_v24  ;;  %v107_v40 = vadd.f32 %v91_v34, %v56_v30  ;;  %v108_v41 = vadd.f32 %v92_v35, %v57_v31  ;;  %v58_v47 = vmul.f32 %v384_v8, %v40_v43 }
  0x26   :  { %v93_v51 = vmul.f32 %v259_v45, %v397_v14  ;;  %v94_v52 = vmul.f32 %v260_v46, %v397_v14  ;;  %v144_v55 = vmul.f32 %v276_v53, %v402_v18  ;;  %v145_v59 = vmul.f32 %v277_v54, %v402_v18 }
  0x27   :  { %295 = vmatpush3.bf16.xpose.msra.mxu0 %v165_v48  ;;  %v168_v39 = vpack.c.bf16 %v157_v33, %v156_v32  ;;  %v59_v48 = vmul.f32 %v384_v8, %v41_v44  ;;  %v158_v49 = vadd.f32 %v142_v38, %v107_v40  ;;  %v159_v50 = vadd.f32 %v143_v42, %v108_v41 }
  0x28   :  { %296 = vmatprep.subr.bf16.mxu0 %v331_v0  ;;  %v109_v57 = vadd.f32 %v93_v51, %v58_v47  ;;  %v60_v1 = vmul.f32 %v384_v8, %v42_v60  ;;  %v95_v5 = vmul.f32 %v261_v62, %v397_v14  ;;  %v96_v6 = vmul.f32 %v262_v63, %v397_v14 }
  0x29   :  { %v169_v56 = vpack.c.bf16 %v159_v50, %v158_v49  ;;  %v110_v58 = vadd.f32 %v94_v52, %v59_v48  ;;  %v146_v10 = vmul.f32 %v278_v7, %v402_v18  ;;  %v147_v13 = vmul.f32 %v279_v9, %v402_v18 }
  0x2a   :  { %v160_v3 = vadd.f32 %v144_v55, %v109_v57  ;;  %v111_v11 = vadd.f32 %v95_v5, %v60_v1 }
  0x2b   :  { %v161_v4 = vadd.f32 %v145_v59, %v110_v58 }
  0x2c   :  { %v162_v15 = vadd.f32 %v146_v10, %v111_v11 }
  0x2f   :  { %297 = vmatpush3.bf16.xpose.msra.mxu0 %v166_v2  ;;  %v61_v2 = vmul.f32 %v384_v8, %v43_v61  ;;  %v170_v8 = vpack.c.bf16 %v161_v4, %v160_v3 }
  0x30   :  { %298 = vmatprep.subr.bf16.mxu0 %v331_v0 }
  0x31   :  { %v112_v12 = vadd.f32 %v96_v6, %v61_v2 }
  0x33   :  { %v163_v14 = vadd.f32 %v147_v13, %v112_v12 }
  0x35   :  { %v171_v16 = vpack.c.bf16 %v163_v14, %v162_v15 }
  0x37   :  { %299 = vmatpush3.bf16.xpose.msra.mxu0 %v167_v22 }
  0x38   :  { %300 = vmatprep.subr.bf16.mxu0 %v331_v0 }
  0x3f   :  { %301 = vmatpush3.bf16.xpose.msra.mxu0 %v168_v39 }
  0x40   :  { %302 = vmatprep.subr.bf16.mxu0 %v331_v0 }
  0x47   :  { %303 = vmatpush3.bf16.xpose.msra.mxu0 %v169_v56 }
  0x48   :  { %304 = vmatprep.subr.bf16.mxu0 %v331_v0 }
  0x4f   :  { %305 = vmatpush3.bf16.xpose.msra.mxu0 %v170_v8 }
  0x50   :  { %306 = vmatprep.subr.bf16.mxu0 %v331_v0 }
  0x57   :  { %307 = vmatpush3.bf16.xpose.msra.mxu0 %v171_v16 }
  0x5e   :  { %309 = vmatmul.mubr.bf16.vlgmr.msra.gmra.mrb[0].mxu0 %v315_v17 }
 0x131   :  { %v216_v19 = vpop.f32.mrb[0].mxu0 }
 0x132   :  { %v310_v21 = vpop.f32.mrb[1].mxu0  ;;  %v239_v18 = vadd.f32 %v282_v20, %v216_v19 }
 0x133   :  { %v219_v22 = vpop.f32.mrb[2].mxu0 }
 0x134   :  { %v311_v23 = vpop.f32.mrb[3].mxu0  ;;  %241 = vst [vmem:[%s584_s4] sm:$0xff] %v239_v18  ;;  %v240_v0 = vadd.f32 %v282_v20, %v219_v22 }
 0x136   :  { %242 = vst [vmem:[%s584_s4 + $0x8] sm:$0xff] %v240_v0 }

</bundles_post_ra>
